<compile_context>
chip_gen: v5e
topology: v5e:2x2
jax: 0.10.0
libtpu: 0.0.40
codegen_flags: <defaults>
</compile_context>

<pallas_src>
import jax
import jax.numpy as jnp
from jax.experimental import pallas as pl
from jax.experimental.pallas import tpu as pltpu

BN_EPS = 1e-5


# --------------------------------------------------------------------------- #
# Kernel
# --------------------------------------------------------------------------- #
def _mlp_kernel(x_ref, w1_ref, b1_ref, w2_ref, b2_ref, w3t_ref, b3_ref, o_ref):
    # x tile: [TB, D]
    x = x_ref[...].astype(jnp.float32)

    # Block 1: Linear -> ReLU   (BN1 already folded into w2/b2, Dropout = id)
    h = jnp.dot(x, w1_ref[...], preferred_element_type=jnp.float32) + b1_ref[...]
    h = jnp.maximum(h, 0.0)

    # Block 2: Linear -> ReLU   (BN2 already folded into w3/b3, Dropout = id)
    h = jnp.dot(h, w2_ref[...], preferred_element_type=jnp.float32) + b2_ref[...]
    h = jnp.maximum(h, 0.0)

    # Head: Linear(32 -> 1) -> Sigmoid, computed transposed so the result is
    # lane-major [1, TB] and the output store is a full-lane, unmasked write.
    #   logits^T[0, t] = sum_k w3t[0, k] * h[t, k]        (trans_b matmul)
    logits_t = jax.lax.dot_general(
        w3t_ref[...], h,
        dimension_numbers=(((1,), (1,)), ((), ())),
        preferred_element_type=jnp.float32,
    ) + b3_ref[...]                                        # [1, TB]

    o_ref[...] = (1.0 / (1.0 + jnp.exp(-logits_t))).astype(o_ref.dtype)


# --------------------------------------------------------------------------- #
# BN folding (trace-time, pure JAX; exact in real arithmetic for eval mode)
# --------------------------------------------------------------------------- #
def _fold_bn(params):
    s1 = params["g1"] * jax.lax.rsqrt(params["v1"] + BN_EPS)   # [1, H1]
    t1 = params["be1"] - params["m1"] * s1
    s2 = params["g2"] * jax.lax.rsqrt(params["v2"] + BN_EPS)   # [1, H2]
    t2 = params["be2"] - params["m2"] * s2

    w1, b1 = params["w1"], params["b1"]
    w2 = params["w2"] * s1.reshape(-1, 1)          # diag(s1) @ W2
    b2 = params["b2"] + t1 @ params["w2"]
    w3 = params["w3"] * s2.reshape(-1, 1)          # diag(s2) @ W3
    b3 = params["b3"] + t2 @ params["w3"]
    return w1, b1, w2, b2, w3.T, b3                # w3 passed transposed: [1, H2]


# --------------------------------------------------------------------------- #
# Wrapper
# --------------------------------------------------------------------------- #
def transaction_validator_forward(x, params, *, block_rows=512):
    """Fused MLP forward pass. x: [batch, input_dim] float32 -> [batch, 1]."""
    batch, d = x.shape
    w1, b1, w2, b2, w3t, b3 = _fold_bn(params)
    h1 = w1.shape[1]
    h2 = w2.shape[1]

    tb = int(block_rows)
    n_tiles = pl.cdiv(batch, tb)
    padded = n_tiles * tb
    if padded != batch:
        # Zero-pad the batch; padded rows produce finite garbage that is
        # sliced off below (rows are independent).
        x = jnp.pad(x, ((0, padded - batch), (0, 0)))

    def const_spec(shape):
        # Full-array block, constant block index -> stays resident in VMEM.
        return pl.BlockSpec(shape, lambda i: (0, 0))

    out = pl.pallas_call(
        _mlp_kernel,
        out_shape=jax.ShapeDtypeStruct((1, padded), jnp.float32),
        grid=(n_tiles,),
        in_specs=[
            pl.BlockSpec((tb, d), lambda i: (i, 0)),   # x: tiled over batch
            const_spec((d, h1)),                       # w1
            const_spec((1, h1)),                       # b1
            const_spec((h1, h2)),                      # w2 (BN1 folded in)
            const_spec((1, h2)),                       # b2 (BN1 folded in)
            const_spec((1, h2)),                       # w3^T (BN2 folded in)
            const_spec((1, 1)),                        # b3  (BN2 folded in)
        ],
        out_specs=pl.BlockSpec((1, tb), lambda i: (0, i)),   # lane-dense slab
        compiler_params=pltpu.CompilerParams(
            dimension_semantics=("parallel",)),
    )(x, w1, b1, w2, b2, w3t, b3)

    # (1, padded) lane-major slab -> (batch, 1)
    return out[0, :batch].reshape(batch, 1)


# --------------------------------------------------------------------------- #
# Parameter init + references
# --------------------------------------------------------------------------- #
def init_params(key, input_dim, hidden_dims=(64, 32)):
    """Deterministic synthetic parameters (shapes match the PyTorch module)."""
    dims = [input_dim] + list(hidden_dims)
    keys = jax.random.split(key, 16)
    ki = iter(range(16))
    p = {}

    def linear(kw, kb, fan_in, fan_out):
        bound = 1.0 / jnp.sqrt(fan_in)
        w = jax.random.uniform(kw, (fan_in, fan_out), jnp.float32, -bound, bound)
        b = jax.random.uniform(kb, (1, fan_out), jnp.float32, -bound, bound)
        return w, b

    p["w1"], p["b1"] = linear(keys[next(ki)], keys[next(ki)], dims[0], dims[1])
    p["g1"] = 1.0 + 0.1 * jax.random.normal(keys[next(ki)], (1, dims[1]), jnp.float32)
    p["be1"] = 0.1 * jax.random.normal(keys[next(ki)], (1, dims[1]), jnp.float32)
    p["m1"] = 0.1 * jax.random.normal(keys[next(ki)], (1, dims[1]), jnp.float32)
    p["v1"] = 0.5 + jax.random.uniform(keys[next(ki)], (1, dims[1]), jnp.float32)

    p["w2"], p["b2"] = linear(keys[next(ki)], keys[next(ki)], dims[1], dims[2])
    p["g2"] = 1.0 + 0.1 * jax.random.normal(keys[next(ki)], (1, dims[2]), jnp.float32)
    p["be2"] = 0.1 * jax.random.normal(keys[next(ki)], (1, dims[2]), jnp.float32)
    p["m2"] = 0.1 * jax.random.normal(keys[next(ki)], (1, dims[2]), jnp.float32)
    p["v2"] = 0.5 + jax.random.uniform(keys[next(ki)], (1, dims[2]), jnp.float32)

    p["w3"], p["b3"] = linear(keys[next(ki)], keys[next(ki)], dims[2], 1)
    return p


def reference_forward(x, p):
    """Pure-JAX reference with explicit (unfolded) eval-mode BatchNorm."""
    h = jnp.maximum(x @ p["w1"] + p["b1"], 0.0)
    h = (h - p["m1"]) / jnp.sqrt(p["v1"] + BN_EPS) * p["g1"] + p["be1"]
    h = jnp.maximum(h @ p["w2"] + p["b2"], 0.0)
    h = (h - p["m2"]) / jnp.sqrt(p["v2"] + BN_EPS) * p["g2"] + p["be2"]
    return jax.nn.sigmoid(h @ p["w3"] + p["b3"])


def reference_forward_folded(x, params):
    """Pure-JAX reference using the same BN-folded weights the kernel uses."""
    w1, b1, w2, b2, w3t, b3 = _fold_bn(params)
    h = jnp.maximum(x @ w1 + b1, 0.0)
    h = jnp.maximum(h @ w2 + b2, 0.0)
    logits = h @ w3t.T + b3
    return 1.0 / (1.0 + jnp.exp(-logits))


# --------------------------------------------------------------------------- #
# Demo / correctness check
# --------------------------------------------------------------------------- #
if __name__ == "__main__":
    key = jax.random.PRNGKey(0)
    kx, kp, kx2 = jax.random.split(key, 3)

    batch, input_dim = 8, 16
    x = jax.random.normal(kx, (batch, input_dim), jnp.float32)
    params = init_params(kp, input_dim, hidden_dims=(64, 32))

    out = jax.block_until_ready(transaction_validator_forward(x, params))
    assert out.shape == (batch, 1)

    # Tight check vs. the algebraically identical folded reference.
    ref_folded = reference_forward_folded(x, params)
    assert jnp.allclose(out, ref_folded, atol=1e-5, rtol=1e-5), "mismatch vs folded ref"
    # Looser check vs. the explicit (unfolded) module semantics: folding changes
    # which values get rounded under the TPU's default matmul precision.
    ref_module = reference_forward(x, params)
    assert jnp.allclose(out, ref_module, atol=5e-3, rtol=0.0), "mismatch vs module ref"

    # Exercise the multi-tile + padded-batch path (grid > 1, batch % TB != 0).
    batch2 = 600
    x2 = jax.random.normal(kx2, (batch2, input_dim), jnp.float32)
    out2 = jax.block_until_ready(
        transaction_validator_forward(x2, params, block_rows=256))
    assert out2.shape == (batch2, 1)
    assert jnp.allclose(out2, reference_forward_folded(x2, params),
                        atol=1e-5, rtol=1e-5), "mismatch vs folded ref (tiled)"

    print("KERNEL_OK")
</pallas_src>

<mosaic_0001>
module attributes {stable_mosaic.version = 11 : i64} {
  func.func @_mlp_kernel(%arg0: i32, %arg1: memref<512x16xf32, #tpu.memory_space<vmem>>, %arg2: memref<16x64xf32, #tpu.memory_space<vmem>>, %arg3: memref<1x64xf32, #tpu.memory_space<vmem>>, %arg4: memref<64x32xf32, #tpu.memory_space<vmem>>, %arg5: memref<1x32xf32, #tpu.memory_space<vmem>>, %arg6: memref<1x32xf32, #tpu.memory_space<vmem>>, %arg7: memref<1x1xf32, #tpu.memory_space<vmem>>, %arg8: memref<1x512xf32, #tpu.memory_space<vmem>>) attributes {dimension_semantics = [#tpu.dimension_semantics<parallel>], iteration_bounds = array<i64: 1>, scalar_prefetch = 0 : i64, scratch_operands = 0 : i64, tpu.core_type = #tpu.core_type<tc>, window_params = [{transform_indices = @transform_0, window_bounds = array<i64: 512, 16>}, {pipeline_mode = #tpu.pipeline_mode<synchronous>, transform_indices = @transform_1, window_bounds = array<i64: 16, 64>}, {pipeline_mode = #tpu.pipeline_mode<synchronous>, transform_indices = @transform_2, window_bounds = array<i64: 1, 64>}, {pipeline_mode = #tpu.pipeline_mode<synchronous>, transform_indices = @transform_3, window_bounds = array<i64: 64, 32>}, {pipeline_mode = #tpu.pipeline_mode<synchronous>, transform_indices = @transform_4, window_bounds = array<i64: 1, 32>}, {pipeline_mode = #tpu.pipeline_mode<synchronous>, transform_indices = @transform_5, window_bounds = array<i64: 1, 32>}, {pipeline_mode = #tpu.pipeline_mode<synchronous>, transform_indices = @transform_6, window_bounds = array<i64: 1, 1>}, {transform_indices = @transform_7, window_bounds = array<i64: 1, 512>}]} {
    %c0 = arith.constant 0 : index
    %c0_0 = arith.constant 0 : index
    %0 = vector.load %arg1[%c0, %c0_0] : memref<512x16xf32, #tpu.memory_space<vmem>>, vector<512x16xf32>
    %c0_1 = arith.constant 0 : index
    %c0_2 = arith.constant 0 : index
    %1 = vector.load %arg2[%c0_1, %c0_2] : memref<16x64xf32, #tpu.memory_space<vmem>>, vector<16x64xf32>
    %cst = arith.constant dense<0.000000e+00> : vector<512x64xf32>
    %2 = tpu.matmul %0, %1, %cst {dimension_numbers = #tpu.dot_dimension_numbers<[1], [0], [0], [1], [0, 0, 1, 1], [], []>} : vector<512x16xf32>, vector<16x64xf32>, vector<512x64xf32> -> vector<512x64xf32>
    %c0_3 = arith.constant 0 : index
    %c0_4 = arith.constant 0 : index
    %3 = vector.load %arg3[%c0_3, %c0_4] : memref<1x64xf32, #tpu.memory_space<vmem>>, vector<1x64xf32>
    %4 = vector.broadcast %3 : vector<1x64xf32> to vector<512x64xf32>
    %5 = arith.addf %2, %4 : vector<512x64xf32>
    %cst_5 = arith.constant 0.000000e+00 : f32
    %6 = vector.broadcast %cst_5 : f32 to vector<512x64xf32>
    %7 = arith.maximumf %5, %6 : vector<512x64xf32>
    %c0_6 = arith.constant 0 : index
    %c0_7 = arith.constant 0 : index
    %8 = vector.load %arg4[%c0_6, %c0_7] : memref<64x32xf32, #tpu.memory_space<vmem>>, vector<64x32xf32>
    %cst_8 = arith.constant dense<0.000000e+00> : vector<512x32xf32>
    %9 = tpu.matmul %7, %8, %cst_8 {dimension_numbers = #tpu.dot_dimension_numbers<[1], [0], [0], [1], [0, 0, 1, 1], [], []>} : vector<512x64xf32>, vector<64x32xf32>, vector<512x32xf32> -> vector<512x32xf32>
    %c0_9 = arith.constant 0 : index
    %c0_10 = arith.constant 0 : index
    %10 = vector.load %arg5[%c0_9, %c0_10] : memref<1x32xf32, #tpu.memory_space<vmem>>, vector<1x32xf32>
    %11 = vector.broadcast %10 : vector<1x32xf32> to vector<512x32xf32>
    %12 = arith.addf %9, %11 : vector<512x32xf32>
    %cst_11 = arith.constant 0.000000e+00 : f32
    %13 = vector.broadcast %cst_11 : f32 to vector<512x32xf32>
    %14 = arith.maximumf %12, %13 : vector<512x32xf32>
    %c0_12 = arith.constant 0 : index
    %c0_13 = arith.constant 0 : index
    %15 = vector.load %arg6[%c0_12, %c0_13] : memref<1x32xf32, #tpu.memory_space<vmem>>, vector<1x32xf32>
    %cst_14 = arith.constant dense<0.000000e+00> : vector<1x512xf32>
    %16 = tpu.matmul %15, %14, %cst_14 {dimension_numbers = #tpu.dot_dimension_numbers<[1], [1], [0], [0], [0, 0, 1, 0], [], []>} : vector<1x32xf32>, vector<512x32xf32>, vector<1x512xf32> -> vector<1x512xf32>
    %c0_15 = arith.constant 0 : index
    %c0_16 = arith.constant 0 : index
    %17 = vector.load %arg7[%c0_15, %c0_16] : memref<1x1xf32, #tpu.memory_space<vmem>>, vector<1x1xf32>
    %18 = vector.broadcast %17 : vector<1x1xf32> to vector<1x512xf32>
    %19 = arith.addf %16, %18 : vector<1x512xf32>
    %cst_17 = arith.constant 0.000000e+00 : f32
    %20 = vector.broadcast %cst_17 : f32 to vector<1x512xf32>
    %21 = arith.subf %20, %19 : vector<1x512xf32>
    %22 = math.exp %21 : vector<1x512xf32>
    %cst_18 = arith.constant 1.000000e+00 : f32
    %23 = vector.broadcast %cst_18 : f32 to vector<1x512xf32>
    %24 = arith.addf %23, %22 : vector<1x512xf32>
    %cst_19 = arith.constant 1.000000e+00 : f32
    %25 = vector.broadcast %cst_19 : f32 to vector<1x512xf32>
    %26 = arith.divf %25, %24 : vector<1x512xf32>
    %c0_20 = arith.constant 0 : index
    %c0_21 = arith.constant 0 : index
    %27 = vector.load %arg8[%c0_20, %c0_21] : memref<1x512xf32, #tpu.memory_space<vmem>>, vector<1x512xf32>
    tpu.vector_store %arg8[%c0_20, %c0_21], %26 {strides = array<i32>} : memref<1x512xf32, #tpu.memory_space<vmem>>, vector<1x512xf32>,
    return
  }
  func.func @transform_0(%arg0: i32) -> (i32, i32) {
    %c0_i32 = arith.constant 0 : i32
    %c0_i32_0 = arith.constant 0 : i32
    return %arg0, %c0_i32 : i32, i32
  }
  func.func @transform_1(%arg0: i32) -> (i32, i32) {
    %c0_i32 = arith.constant 0 : i32
    %c0_i32_0 = arith.constant 0 : i32
    %c0_i32_1 = arith.constant 0 : i32
    return %c0_i32, %c0_i32_0 : i32, i32
  }
  func.func @transform_2(%arg0: i32) -> (i32, i32) {
    %c0_i32 = arith.constant 0 : i32
    %c0_i32_0 = arith.constant 0 : i32
    %c0_i32_1 = arith.constant 0 : i32
    return %c0_i32, %c0_i32_0 : i32, i32
  }
  func.func @transform_3(%arg0: i32) -> (i32, i32) {
    %c0_i32 = arith.constant 0 : i32
    %c0_i32_0 = arith.constant 0 : i32
    %c0_i32_1 = arith.constant 0 : i32
    return %c0_i32, %c0_i32_0 : i32, i32
  }
  func.func @transform_4(%arg0: i32) -> (i32, i32) {
    %c0_i32 = arith.constant 0 : i32
    %c0_i32_0 = arith.constant 0 : i32
    %c0_i32_1 = arith.constant 0 : i32
    return %c0_i32, %c0_i32_0 : i32, i32
  }
  func.func @transform_5(%arg0: i32) -> (i32, i32) {
    %c0_i32 = arith.constant 0 : i32
    %c0_i32_0 = arith.constant 0 : i32
    %c0_i32_1 = arith.constant 0 : i32
    return %c0_i32, %c0_i32_0 : i32, i32
  }
  func.func @transform_6(%arg0: i32) -> (i32, i32) {
    %c0_i32 = arith.constant 0 : i32
    %c0_i32_0 = arith.constant 0 : i32
    %c0_i32_1 = arith.constant 0 : i32
    return %c0_i32, %c0_i32_0 : i32, i32
  }
  func.func @transform_7(%arg0: i32) -> (i32, i32) {
    %c0_i32 = arith.constant 0 : i32
    %c0_i32_0 = arith.constant 0 : i32
    return %c0_i32, %arg0 : i32, i32
  }
}

</mosaic_0001>

<bundles_post_ra>
// kernel: tpu_custom_call.1
= control target key start
LH: loop header
LB: loop body
LE: loop exit
PB: predicated region body
PF: predicated region fallthrough
CT: control target
= control target key end

     0   :  { %s2442_s0 = inlined_call_operand.vmem [shape: f32[512,16], index: 0, kind: input, shape index: {}]   ;;  %s2443_s1 = inlined_call_operand.vmem [shape: f32[16,64], index: 1, kind: input, shape index: {}]   ;;  %s2444_s2 = inlined_call_operand.vmem [shape: f32[1,64], index: 2, kind: input, shape index: {}]   ;;  %s2445_s3 = inlined_call_operand.vmem [shape: f32[64,32], index: 3, kind: input, shape index: {}]   ;;  %s2446_s4 = inlined_call_operand.vmem [shape: f32[1,32], index: 4, kind: input, shape index: {}]   ;;  %s2447_s5 = inlined_call_operand.vmem [shape: f32[1,32], index: 5, kind: input, shape index: {}]   ;;  %s2448_s6 = inlined_call_operand.<no memory space> [shape: f32[1,1], index: 6, kind: input, shape index: {}]   ;;  %s2449_s7 = inlined_call_operand.hbm [shape: f32[1,512], index: 7, kind: output, shape index: {}]  }
   0x1   :  { %v12_v0 = vstv %s2448_s6 }
   0x2   :  { %13 = vst [vmem:[#allocation2] sm:$0x1] %v12_v0 }
   0x3   :  { %v94_v1 = vld [vmem:[%s2443_s1 + $0x8] sm:$0xff]  ;;  %v93_v2 = vld [vmem:[%s2443_s1] sm:$0xff]  ;;  %vm99_vm0 = vcmask 130048  }
   0x4   :  { %306 = vmatpush.msra.mxu0 %v94_v1  ;;  %v29_v3 = vld [vmem:[%s2442_s0] sm:$0xff]  ;;  %1634 = vmatpush.msra.mxu3 %v94_v1 }
   0x6   :  { %307 = vmatpush.msra.mxu0 %v93_v2  ;;  %1635 = vmatpush.msra.mxu3 %v93_v2 }
   0x7   :  { %14 = vsyncpa [#allocation4], 0  ;;  %1438 = vmatmul.msk.f32.vlgmr.msra.gmra.mxu0 %vm99_vm0, %v29_v3  ;;  %v30_v4 = vld [vmem:[%s2442_s0 + $0x8] sm:$0xff]  ;;  %v31_v5 = vld [vmem:[%s2442_s0 + $0x10] sm:$0xff]  ;;  %vm577_vm1 = vcmask 523264   ;;  %vm1051_vm2 = vcmask 261120  }
   0x8   :  { %v32_v6 = vld [vmem:[%s2442_s0 + $0x18] sm:$0xff]  ;;  %v33_v7 = vld [vmem:[%s2442_s0 + $0x20] sm:$0xff]  ;;  %v34_v8 = vld [vmem:[%s2442_s0 + $0x28] sm:$0xff] }
   0x9   :  { %v35_v9 = vld [vmem:[%s2442_s0 + $0x30] sm:$0xff]  ;;  %v36_v10 = vld [vmem:[%s2442_s0 + $0x38] sm:$0xff]  ;;  %v37_v11 = vld [vmem:[%s2442_s0 + $0x40] sm:$0xff] }
   0xa   :  { %v67_v12 = vld [vmem:[%s2442_s0 + $0x130] sm:$0xff]  ;;  %v38_v13 = vld [vmem:[%s2442_s0 + $0x48] sm:$0xff]  ;;  %v68_v14 = vld [vmem:[%s2442_s0 + $0x138] sm:$0xff] }
   0xb   :  { %1476 = vmatmul.msk.f32.vlgmr.msra.gmra.mxu3 %vm99_vm0, %v67_v12  ;;  %v39_v15 = vld [vmem:[%s2442_s0 + $0x50] sm:$0xff]  ;;  %v69_v16 = vld [vmem:[%s2442_s0 + $0x140] sm:$0xff]  ;;  %v572_v17 = vld [vmem:[%s2445_s3 + $0x38] sm:$0xff] }
   0xc   :  { %v571_v18 = vld [vmem:[%s2445_s3 + $0x30] sm:$0xff]  ;;  %778 = vmatpush.msra.mxu1 %v572_v17  ;;  %v570_v19 = vld [vmem:[%s2445_s3 + $0x28] sm:$0xff]  ;;  %1636 = vmatpush.msra.mxu2 %v572_v17  ;;  %v40_v20 = vld [vmem:[%s2442_s0 + $0x58] sm:$0xff] }
   0xd   :  { %v70_v21 = vld [vmem:[%s2442_s0 + $0x148] sm:$0xff]  ;;  %v569_v22 = vld [vmem:[%s2445_s3 + $0x20] sm:$0xff]  ;;  %v568_v23 = vld [vmem:[%s2445_s3 + $0x18] sm:$0xff] }
   0xe   :  { %779 = vmatpush.msra.mxu1 %v571_v18  ;;  %1637 = vmatpush.msra.mxu2 %v571_v18  ;;  %v567_v24 = vld [vmem:[%s2445_s3 + $0x10] sm:$0xff]  ;;  %v41_v25 = vld [vmem:[%s2442_s0 + $0x60] sm:$0xff]  ;;  %v566_v26 = vld [vmem:[%s2445_s3 + $0x8] sm:$0xff] }
   0xf   :  { %1439 = vmatmul.msk.f32.gmra.mxu0 %vm99_vm0, %v30_v4  ;;  %v71_v27 = vld [vmem:[%s2442_s0 + $0x150] sm:$0xff]  ;;  %v565_v28 = vld [vmem:[%s2445_s3] sm:$0xff]  ;;  %v42_v29 = vld [vmem:[%s2442_s0 + $0x68] sm:$0xff] }
  0x10   :  { %780 = vmatpush.msra.mxu1 %v570_v19  ;;  %1638 = vmatpush.msra.mxu2 %v570_v19  ;;  %v72_v30 = vld [vmem:[%s2442_s0 + $0x158] sm:$0xff]  ;;  %v43_v31 = vld [vmem:[%s2442_s0 + $0x70] sm:$0xff]  ;;  %v73_v32 = vld [vmem:[%s2442_s0 + $0x160] sm:$0xff] }
  0x11   :  { %v44_v33 = vld [vmem:[%s2442_s0 + $0x78] sm:$0xff]  ;;  %v74_v34 = vld [vmem:[%s2442_s0 + $0x168] sm:$0xff]  ;;  %v1865_v35 = vld [vmem:[%s2444_s2] ss:$0 sm:$0xff]  ;;  %s1429_s2 = sshll.u32 %s2449_s7, 4  ;;  %s1430_s2 = int_to_ptr.hbm [resolvable:$true] %s1429_s2 }
  0x12   :  { %781 = vmatpush.msra.mxu1 %v569_v22  ;;  %1639 = vmatpush.msra.mxu2 %v569_v22  ;;  %v45_v37 = vld [vmem:[%s2442_s0 + $0x80] sm:$0xff]  ;;  %v75_v40 = vld [vmem:[%s2442_s0 + $0x170] sm:$0xff]  ;;  %v46_v42 = vld [vmem:[%s2442_s0 + $0x88] sm:$0xff] }
  0x13   :  { %1477 = vmatmul.msk.f32.gmra.mxu3 %vm99_vm0, %v68_v14  ;;  %v76_v45 = vld [vmem:[%s2442_s0 + $0x178] sm:$0xff]  ;;  %v47_v47 = vld [vmem:[%s2442_s0 + $0x90] sm:$0xff]  ;;  %v77_v50 = vld [vmem:[%s2442_s0 + $0x180] sm:$0xff] }
  0x14   :  { %782 = vmatpush.msra.mxu1 %v568_v23  ;;  %1640 = vmatpush.msra.mxu2 %v568_v23  ;;  %v48_v52 = vld [vmem:[%s2442_s0 + $0x98] sm:$0xff]  ;;  %v78_v55 = vld [vmem:[%s2442_s0 + $0x188] sm:$0xff]  ;;  %v49_v57 = vld [vmem:[%s2442_s0 + $0xa0] sm:$0xff] }
  0x15   :  { %v79_v60 = vld [vmem:[%s2442_s0 + $0x190] sm:$0xff]  ;;  %v50_v62 = vld [vmem:[%s2442_s0 + $0xa8] sm:$0xff]  ;;  %v80_v1 = vld [vmem:[%s2442_s0 + $0x198] sm:$0xff] }
  0x16   :  { %783 = vmatpush.msra.mxu1 %v567_v24  ;;  %1641 = vmatpush.msra.mxu2 %v567_v24  ;;  %v51_v3 = vld [vmem:[%s2442_s0 + $0xb0] sm:$0xff]  ;;  %v54_v19 = vld [vmem:[%s2442_s0 + $0xc8] sm:$0xff]  ;;  %v84_v24 = vld [vmem:[%s2442_s0 + $0x1b8] sm:$0xff] }
  0x17   :  { %1440 = vmatmul.msk.f32.gmra.mxu0 %vm99_vm0, %v31_v5 }
  0x18   :  { %784 = vmatpush.msra.mxu1 %v566_v26  ;;  %1642 = vmatpush.msra.mxu2 %v566_v26 }
  0x1a   :  { %785 = vmatpush.msra.mxu1 %v565_v28  ;;  %1643 = vmatpush.msra.mxu2 %v565_v28 }
  0x1b   :  { %1478 = vmatmul.msk.f32.gmra.mxu3 %vm99_vm0, %v69_v16  ;;  %v83_v16 = vld [vmem:[%s2442_s0 + $0x1b0] sm:$0xff] }
  0x1f   :  { %1441 = vmatmul.msk.f32.gmra.mxu0 %vm99_vm0, %v32_v6  ;;  %v81_v6 = vld [vmem:[%s2442_s0 + $0x1a0] sm:$0xff] }
  0x23   :  { %1479 = vmatmul.msk.f32.gmra.mxu3 %vm99_vm0, %v70_v21 }
  0x27   :  { %1442 = vmatmul.msk.f32.gmra.mxu0 %vm99_vm0, %v33_v7 }
  0x2b   :  { %1480 = vmatmul.msk.f32.gmra.mxu3 %vm99_vm0, %v71_v27  ;;  %v55_v27 = vld [vmem:[%s2442_s0 + $0xd0] sm:$0xff] }
  0x2f   :  { %1443 = vmatmul.msk.f32.gmra.mxu0 %vm99_vm0, %v34_v8  ;;  %v52_v8 = vld [vmem:[%s2442_s0 + $0xb8] sm:$0xff] }
  0x33   :  { %1481 = vmatmul.msk.f32.gmra.mxu3 %vm99_vm0, %v72_v30 }
  0x37   :  { %1444 = vmatmul.msk.f32.gmra.mxu0 %vm99_vm0, %v35_v9 }
  0x3b   :  { %1482 = vmatmul.msk.f32.gmra.mxu3 %vm99_vm0, %v73_v32  ;;  %v85_v32 = vld [vmem:[%s2442_s0 + $0x1c0] sm:$0xff] }
  0x3f   :  { %1445 = vmatmul.msk.f32.gmra.mxu0 %vm99_vm0, %v36_v10 }
  0x43   :  { %1483 = vmatmul.msk.f32.gmra.mxu3 %vm99_vm0, %v74_v34 }
  0x47   :  { %1446 = vmatmul.msk.f32.gmra.mxu0 %vm99_vm0, %v37_v11  ;;  %v82_v11 = vld [vmem:[%s2442_s0 + $0x1a8] sm:$0xff] }
  0x4b   :  { %1484 = vmatmul.msk.f32.gmra.mxu3 %vm99_vm0, %v75_v40 }
  0x4f   :  { %1447 = vmatmul.msk.f32.gmra.mxu0 %vm99_vm0, %v38_v13  ;;  %v53_v13 = vld [vmem:[%s2442_s0 + $0xc0] sm:$0xff] }
  0x53   :  { %1485 = vmatmul.msk.f32.gmra.mxu3 %vm99_vm0, %v76_v45 }
  0x57   :  { %1448 = vmatmul.msk.f32.gmra.mxu0 %vm99_vm0, %v39_v15 }
  0x5b   :  { %1486 = vmatmul.msk.f32.gmra.mxu3 %vm99_vm0, %v77_v50 }
  0x5f   :  { %1449 = vmatmul.msk.f32.gmra.mxu0 %vm99_vm0, %v40_v20 }
  0x63   :  { %1487 = vmatmul.msk.f32.gmra.mxu3 %vm99_vm0, %v78_v55 }
  0x67   :  { %1450 = vmatmul.msk.f32.gmra.mxu0 %vm99_vm0, %v41_v25 }
  0x6b   :  { %1488 = vmatmul.msk.f32.gmra.mxu3 %vm99_vm0, %v79_v60  ;;  %v59_v60 = vld [vmem:[%s2442_s0 + $0xf0] sm:$0xff] }
  0x6f   :  { %1451 = vmatmul.msk.f32.gmra.mxu0 %vm99_vm0, %v42_v29 }
  0x73   :  { %1489 = vmatmul.msk.f32.gmra.mxu3 %vm99_vm0, %v80_v1  ;;  %v89_v1 = vld [vmem:[%s2442_s0 + $0x1e0] sm:$0xff] }
  0x77   :  { %1452 = vmatmul.msk.f32.gmra.mxu0 %vm99_vm0, %v43_v31 }
  0x7b   :  { %1490 = vmatmul.msk.f32.gmra.mxu3 %vm99_vm0, %v81_v6 }
  0x7f   :  { %1453 = vmatmul.msk.f32.gmra.mxu0 %vm99_vm0, %v44_v33 }
  0x83   :  { %1491 = vmatmul.msk.f32.gmra.mxu3 %vm99_vm0, %v82_v11 }
  0x84   :  { %v309_v36 = vpop.f32.mrf.mxu0 }
  0x85   :  { %v310_v38 = vadd.f32 %v1865_v35, %v309_v36  ;;  %v56_v36 = vld [vmem:[%s2442_s0 + $0xd8] sm:$0xff] }
  0x87   :  { %v501_v39 = vmax.f32 %v310_v38, 0.0  ;;  %1454 = vmatmul.msk.f32.gmra.mxu0 %vm99_vm0, %v45_v37 }
  0x89   :  { %1502 = vmatmul.msk.f32.vlgmr.msra.gmra.mxu1 %vm577_vm1, %v501_v39 }
  0x8b   :  { %1492 = vmatmul.msk.f32.gmra.mxu3 %vm99_vm0, %v83_v16 }
  0x8c   :  { %v312_v41 = vpop.f32.mrf.mxu0 }
  0x8d   :  { %v313_v43 = vadd.f32 %v1865_v35, %v312_v41  ;;  %v86_v41 = vld [vmem:[%s2442_s0 + $0x1c8] sm:$0xff] }
  0x8e   :  { %v423_v17 = vpop.f32.mrf.mxu3 }
  0x8f   :  { %v502_v44 = vmax.f32 %v313_v43, 0.0  ;;  %1455 = vmatmul.msk.f32.gmra.mxu0 %vm99_vm0, %v46_v42  ;;  %v424_v20 = vadd.f32 %v1865_v35, %v423_v17 }
  0x91   :  { %1503 = vmatmul.msk.f32.gmra.mxu1 %vm577_vm1, %v502_v44  ;;  %v539_v22 = vmax.f32 %v424_v20, 0.0  ;;  %v57_v44 = vld [vmem:[%s2442_s0 + $0xe0] sm:$0xff] }
  0x93   :  { %1493 = vmatmul.msk.f32.gmra.mxu3 %vm99_vm0, %v84_v24  ;;  %1540 = vmatmul.msk.f32.vlgmr.msra.gmra.mxu2 %vm577_vm1, %v539_v22  ;;  %v62_v22 = vld [vmem:[%s2442_s0 + $0x108] sm:$0xff] }
  0x94   :  { %v315_v46 = vpop.f32.mrf.mxu0 }
  0x95   :  { %v316_v48 = vadd.f32 %v1865_v35, %v315_v46 }
  0x96   :  { %v426_v25 = vpop.f32.mrf.mxu3 }
  0x97   :  { %v503_v49 = vmax.f32 %v316_v48, 0.0  ;;  %1456 = vmatmul.msk.f32.gmra.mxu0 %vm99_vm0, %v47_v47  ;;  %v427_v28 = vadd.f32 %v1865_v35, %v426_v25 }
  0x99   :  { %1504 = vmatmul.msk.f32.gmra.mxu1 %vm577_vm1, %v503_v49  ;;  %v540_v30 = vmax.f32 %v427_v28, 0.0  ;;  %v87_v49 = vld [vmem:[%s2442_s0 + $0x1d0] sm:$0xff] }
  0x9b   :  { %1494 = vmatmul.msk.f32.gmra.mxu3 %vm99_vm0, %v85_v32  ;;  %1541 = vmatmul.msk.f32.gmra.mxu2 %vm577_vm1, %v540_v30 }
  0x9c   :  { %v318_v51 = vpop.f32.mrf.mxu0 }
  0x9d   :  { %v319_v53 = vadd.f32 %v1865_v35, %v318_v51 }
  0x9e   :  { %v429_v33 = vpop.f32.mrf.mxu3 }
  0x9f   :  { %v504_v54 = vmax.f32 %v319_v53, 0.0  ;;  %1457 = vmatmul.msk.f32.gmra.mxu0 %vm99_vm0, %v48_v52  ;;  %v430_v37 = vadd.f32 %v1865_v35, %v429_v33  ;;  %v58_v52 = vld [vmem:[%s2442_s0 + $0xe8] sm:$0xff] }
  0xa1   :  { %1505 = vmatmul.msk.f32.gmra.mxu1 %vm577_vm1, %v504_v54  ;;  %v541_v39 = vmax.f32 %v430_v37, 0.0 }
  0xa3   :  { %1495 = vmatmul.msk.f32.gmra.mxu3 %vm99_vm0, %v86_v41  ;;  %1542 = vmatmul.msk.f32.gmra.mxu2 %vm577_vm1, %v541_v39 }
  0xa4   :  { %v321_v56 = vpop.f32.mrf.mxu0 }
  0xa5   :  { %v322_v58 = vadd.f32 %v1865_v35, %v321_v56 }
  0xa6   :  { %v432_v42 = vpop.f32.mrf.mxu3 }
  0xa7   :  { %v505_v59 = vmax.f32 %v322_v58, 0.0  ;;  %1458 = vmatmul.msk.f32.gmra.mxu0 %vm99_vm0, %v49_v57  ;;  %v433_v45 = vadd.f32 %v1865_v35, %v432_v42  ;;  %v88_v57 = vld [vmem:[%s2442_s0 + $0x1d8] sm:$0xff] }
  0xa9   :  { %1506 = vmatmul.msk.f32.gmra.mxu1 %vm577_vm1, %v505_v59  ;;  %v542_v47 = vmax.f32 %v433_v45, 0.0 }
  0xab   :  { %1496 = vmatmul.msk.f32.gmra.mxu3 %vm99_vm0, %v87_v49  ;;  %1543 = vmatmul.msk.f32.gmra.mxu2 %vm577_vm1, %v542_v47 }
  0xac   :  { %v324_v61 = vpop.f32.mrf.mxu0 }
  0xad   :  { %v325_v63 = vadd.f32 %v1865_v35, %v324_v61 }
  0xae   :  { %v435_v50 = vpop.f32.mrf.mxu3 }
  0xaf   :  { %v506_v0 = vmax.f32 %v325_v63, 0.0  ;;  %1459 = vmatmul.msk.f32.gmra.mxu0 %vm99_vm0, %v50_v62  ;;  %v436_v53 = vadd.f32 %v1865_v35, %v435_v50 }
  0xb1   :  { %1507 = vmatmul.msk.f32.gmra.mxu1 %vm577_vm1, %v506_v0  ;;  %v543_v55 = vmax.f32 %v436_v53, 0.0 }
  0xb3   :  { %1497 = vmatmul.msk.f32.gmra.mxu3 %vm99_vm0, %v88_v57  ;;  %1544 = vmatmul.msk.f32.gmra.mxu2 %vm577_vm1, %v543_v55 }
  0xb4   :  { %v327_v2 = vpop.f32.mrf.mxu0 }
  0xb5   :  { %v328_v4 = vadd.f32 %v1865_v35, %v327_v2 }
  0xb6   :  { %v438_v58 = vpop.f32.mrf.mxu3 }
  0xb7   :  { %v507_v5 = vmax.f32 %v328_v4, 0.0  ;;  %1460 = vmatmul.msk.f32.gmra.mxu0 %vm99_vm0, %v51_v3  ;;  %v439_v61 = vadd.f32 %v1865_v35, %v438_v58  ;;  %v60_v4 = vld [vmem:[%s2442_s0 + $0xf8] sm:$0xff] }
  0xb9   :  { %1508 = vmatmul.msk.f32.gmra.mxu1 %vm577_vm1, %v507_v5  ;;  %v544_v63 = vmax.f32 %v439_v61, 0.0 }
  0xbb   :  { %1498 = vmatmul.msk.f32.gmra.mxu3 %vm99_vm0, %v89_v1  ;;  %1545 = vmatmul.msk.f32.gmra.mxu2 %vm577_vm1, %v544_v63 }
  0xbc   :  { %v330_v7 = vpop.f32.mrf.mxu0 }
  0xbd   :  { %v331_v9 = vadd.f32 %v1865_v35, %v330_v7 }
  0xbe   :  { %v441_v2 = vpop.f32.mrf.mxu3 }
  0xbf   :  { %v508_v10 = vmax.f32 %v331_v9, 0.0  ;;  %1461 = vmatmul.msk.f32.gmra.mxu0 %vm99_vm0, %v52_v8  ;;  %v442_v5 = vadd.f32 %v1865_v35, %v441_v2  ;;  %v90_v9 = vld [vmem:[%s2442_s0 + $0x1e8] sm:$0xff] }
  0xc1   :  { %1509 = vmatmul.msk.f32.gmra.mxu1 %vm577_vm1, %v508_v10  ;;  %v545_v7 = vmax.f32 %v442_v5, 0.0 }
  0xc3   :  { %1499 = vmatmul.msk.f32.gmra.mxu3 %vm99_vm0, %v90_v9  ;;  %1546 = vmatmul.msk.f32.gmra.mxu2 %vm577_vm1, %v545_v7 }
  0xc4   :  { %v333_v12 = vpop.f32.mrf.mxu0 }
  0xc5   :  { %v334_v14 = vadd.f32 %v1865_v35, %v333_v12 }
  0xc6   :  { %v444_v10 = vpop.f32.mrf.mxu3 }
  0xc7   :  { %v509_v15 = vmax.f32 %v334_v14, 0.0  ;;  %1462 = vmatmul.msk.f32.gmra.mxu0 %vm99_vm0, %v53_v13  ;;  %v445_v12 = vadd.f32 %v1865_v35, %v444_v10  ;;  %v61_v13 = vld [vmem:[%s2442_s0 + $0x100] sm:$0xff] }
  0xc9   :  { %1510 = vmatmul.msk.f32.gmra.mxu1 %vm577_vm1, %v509_v15  ;;  %v546_v16 = vmax.f32 %v445_v12, 0.0 }
  0xcb   :  { %1547 = vmatmul.msk.f32.gmra.mxu2 %vm577_vm1, %v546_v16 }
  0xcc   :  { %v336_v18 = vpop.f32.mrf.mxu0 }
  0xcd   :  { %v337_v21 = vadd.f32 %v1865_v35, %v336_v18  ;;  %v91_v18 = vld [vmem:[%s2442_s0 + $0x1f0] sm:$0xff] }
  0xce   :  { %1500 = vmatmul.msk.f32.gmra.mxu3 %vm99_vm0, %v91_v18 }
  0xcf   :  { %v510_v23 = vmax.f32 %v337_v21, 0.0  ;;  %1463 = vmatmul.msk.f32.gmra.mxu0 %vm99_vm0, %v54_v19  ;;  %v447_v19 = vpop.f32.mrf.mxu3 }
  0xd0   :  { %v448_v21 = vadd.f32 %v1865_v35, %v447_v19 }
  0xd1   :  { %1511 = vmatmul.msk.f32.gmra.mxu1 %vm577_vm1, %v510_v23 }
  0xd2   :  { %v547_v25 = vmax.f32 %v448_v21, 0.0 }
  0xd4   :  { %v339_v26 = vpop.f32.mrf.mxu0  ;;  %1548 = vmatmul.msk.f32.gmra.mxu2 %vm577_vm1, %v547_v25 }
  0xd5   :  { %v340_v29 = vadd.f32 %v1865_v35, %v339_v26 }
  0xd7   :  { %v511_v31 = vmax.f32 %v340_v29, 0.0  ;;  %1464 = vmatmul.msk.f32.gmra.mxu0 %vm99_vm0, %v55_v27  ;;  %v92_v27 = vld [vmem:[%s2442_s0 + $0x1f8] sm:$0xff]  ;;  %v450_v28 = vpop.f32.mrf.mxu3 }
  0xd8   :  { %1501 = vmatmul.msk.f32.gmra.mxu3 %vm99_vm0, %v92_v27  ;;  %v451_v30 = vadd.f32 %v1865_v35, %v450_v28 }
  0xd9   :  { %1512 = vmatmul.msk.f32.gmra.mxu1 %vm577_vm1, %v511_v31  ;;  %v63_v31 = vld [vmem:[%s2442_s0 + $0x110] sm:$0xff] }
  0xdc   :  { %v342_v34 = vpop.f32.mrf.mxu0 }
  0xdd   :  { %v343_v38 = vadd.f32 %v1865_v35, %v342_v34  ;;  %v548_v34 = vmax.f32 %v451_v30, 0.0 }
  0xdf   :  { %v512_v40 = vmax.f32 %v343_v38, 0.0  ;;  %1465 = vmatmul.msk.f32.gmra.mxu0 %vm99_vm0, %v56_v36  ;;  %1549 = vmatmul.msk.f32.gmra.mxu2 %vm577_vm1, %v548_v34  ;;  %v453_v37 = vpop.f32.mrf.mxu3 }
  0xe0   :  { %v454_v39 = vadd.f32 %v1865_v35, %v453_v37 }
  0xe1   :  { %1513 = vmatmul.msk.f32.gmra.mxu1 %vm577_vm1, %v512_v40  ;;  %v64_v40 = vld [vmem:[%s2442_s0 + $0x118] sm:$0xff] }
  0xe4   :  { %v345_v43 = vpop.f32.mrf.mxu0 }
  0xe5   :  { %v346_v46 = vadd.f32 %v1865_v35, %v345_v43  ;;  %v549_v43 = vmax.f32 %v454_v39, 0.0 }
  0xe7   :  { %v513_v48 = vmax.f32 %v346_v46, 0.0  ;;  %1466 = vmatmul.msk.f32.gmra.mxu0 %vm99_vm0, %v57_v44  ;;  %1550 = vmatmul.msk.f32.gmra.mxu2 %vm577_vm1, %v549_v43  ;;  %v456_v45 = vpop.f32.mrf.mxu3 }
  0xe8   :  { %v457_v47 = vadd.f32 %v1865_v35, %v456_v45 }
  0xe9   :  { %1514 = vmatmul.msk.f32.gmra.mxu1 %vm577_vm1, %v513_v48  ;;  %v65_v48 = vld [vmem:[%s2442_s0 + $0x120] sm:$0xff] }
  0xec   :  { %v348_v51 = vpop.f32.mrf.mxu0 }
  0xed   :  { %v349_v54 = vadd.f32 %v1865_v35, %v348_v51  ;;  %v550_v51 = vmax.f32 %v457_v47, 0.0 }
  0xef   :  { %v514_v56 = vmax.f32 %v349_v54, 0.0  ;;  %1467 = vmatmul.msk.f32.gmra.mxu0 %vm99_vm0, %v58_v52  ;;  %1551 = vmatmul.msk.f32.gmra.mxu2 %vm577_vm1, %v550_v51  ;;  %v459_v53 = vpop.f32.mrf.mxu3 }
  0xf0   :  { %v460_v55 = vadd.f32 %v1865_v35, %v459_v53 }
  0xf1   :  { %1515 = vmatmul.msk.f32.gmra.mxu1 %vm577_vm1, %v514_v56  ;;  %v66_v56 = vld [vmem:[%s2442_s0 + $0x128] sm:$0xff] }
  0xf4   :  { %v351_v59 = vpop.f32.mrf.mxu0 }
  0xf5   :  { %v352_v62 = vadd.f32 %v1865_v35, %v351_v59  ;;  %v551_v59 = vmax.f32 %v460_v55, 0.0 }
  0xf7   :  { %v515_v0 = vmax.f32 %v352_v62, 0.0  ;;  %1468 = vmatmul.msk.f32.gmra.mxu0 %vm99_vm0, %v59_v60  ;;  %1552 = vmatmul.msk.f32.gmra.mxu2 %vm577_vm1, %v551_v59  ;;  %v462_v61 = vpop.f32.mrf.mxu3 }
  0xf8   :  { %v463_v63 = vadd.f32 %v1865_v35, %v462_v61 }
  0xf9   :  { %1516 = vmatmul.msk.f32.gmra.mxu1 %vm577_vm1, %v515_v0 }
  0xfa   :  { %v552_v2 = vmax.f32 %v463_v63, 0.0 }
  0xfc   :  { %v354_v3 = vpop.f32.mrf.mxu0 }
  0xfd   :  { %v355_v6 = vadd.f32 %v1865_v35, %v354_v3 }
  0xff   :  { %v516_v8 = vmax.f32 %v355_v6, 0.0  ;;  %1469 = vmatmul.msk.f32.gmra.mxu0 %vm99_vm0, %v60_v4  ;;  %1553 = vmatmul.msk.f32.gmra.mxu2 %vm577_vm1, %v552_v2  ;;  %v465_v4 = vpop.f32.mrf.mxu3 }
 0x100   :  { %v466_v6 = vadd.f32 %v1865_v35, %v465_v4 }
 0x101   :  { %1517 = vmatmul.msk.f32.gmra.mxu1 %vm577_vm1, %v516_v8 }
 0x102   :  { %v553_v9 = vmax.f32 %v466_v6, 0.0 }
 0x104   :  { %v357_v11 = vpop.f32.mrf.mxu0 }
 0x105   :  { %v358_v14 = vadd.f32 %v1865_v35, %v357_v11 }
 0x106   :  { %v2046_v15 = vpop.f32.mrf.mxu1 }
 0x107   :  { %v517_v17 = vmax.f32 %v358_v14, 0.0  ;;  %1470 = vmatmul.msk.f32.gmra.mxu0 %vm99_vm0, %v61_v13  ;;  %1554 = vmatmul.msk.f32.gmra.mxu2 %vm577_vm1, %v553_v9  ;;  %v468_v11 = vpop.f32.mrf.mxu3 }
 0x108   :  { %v469_v13 = vadd.f32 %v1865_v35, %v468_v11 }
 0x109   :  { %1518 = vmatmul.msk.f32.gmra.mxu1 %vm577_vm1, %v517_v17 }
 0x10a   :  { %v554_v17 = vmax.f32 %v469_v13, 0.0 }
 0x10c   :  { %v360_v20 = vpop.f32.mrf.mxu0 }
 0x10d   :  { %v361_v23 = vadd.f32 %v1865_v35, %v360_v20 }
 0x10e   :  { %v2060_v24 = vpop.f32.mrf.mxu1 }
 0x10f   :  { %v518_v26 = vmax.f32 %v361_v23, 0.0  ;;  %1471 = vmatmul.msk.f32.gmra.mxu0 %vm99_vm0, %v62_v22  ;;  %1555 = vmatmul.msk.f32.gmra.mxu2 %vm577_vm1, %v554_v17  ;;  %v471_v19 = vpop.f32.mrf.mxu3 }
 0x110   :  { %v472_v21 = vadd.f32 %v1865_v35, %v471_v19 }
 0x111   :  { %1519 = vmatmul.msk.f32.gmra.mxu1 %vm577_vm1, %v518_v26 }
 0x112   :  { %v555_v25 = vmax.f32 %v472_v21, 0.0 }
 0x114   :  { %v363_v29 = vpop.f32.mrf.mxu0 }
 0x115   :  { %v364_v32 = vadd.f32 %v1865_v35, %v363_v29 }
 0x116   :  { %v2074_v33 = vpop.f32.mrf.mxu1  ;;  %v2133_v28 = vpop.f32.mrf.mxu2 }
 0x117   :  { %v519_v36 = vmax.f32 %v364_v32, 0.0  ;;  %1472 = vmatmul.msk.f32.gmra.mxu0 %vm99_vm0, %v63_v31  ;;  %1556 = vmatmul.msk.f32.gmra.mxu2 %vm577_vm1, %v555_v25  ;;  %v474_v27 = vpop.f32.mrf.mxu3 }
 0x118   :  { %v475_v30 = vadd.f32 %v1865_v35, %v474_v27 }
 0x119   :  { %1520 = vmatmul.msk.f32.gmra.mxu1 %vm577_vm1, %v519_v36 }
 0x11a   :  { %v556_v34 = vmax.f32 %v475_v30, 0.0 }
 0x11c   :  { %v366_v38 = vpop.f32.mrf.mxu0 }
 0x11d   :  { %v367_v41 = vadd.f32 %v1865_v35, %v366_v38 }
 0x11e   :  { %v2084_v42 = vpop.f32.mrf.mxu1  ;;  %v2141_v38 = vpop.f32.mrf.mxu2 }
 0x11f   :  { %v520_v44 = vmax.f32 %v367_v41, 0.0  ;;  %1473 = vmatmul.msk.f32.gmra.mxu0 %vm99_vm0, %v64_v40  ;;  %1557 = vmatmul.msk.f32.gmra.mxu2 %vm577_vm1, %v556_v34  ;;  %v477_v37 = vpop.f32.mrf.mxu3 }
 0x120   :  { %v478_v40 = vadd.f32 %v1865_v35, %v477_v37 }
 0x121   :  { %1521 = vmatmul.msk.f32.gmra.mxu1 %vm577_vm1, %v520_v44 }
 0x122   :  { %v557_v44 = vmax.f32 %v478_v40, 0.0 }
 0x124   :  { %v369_v46 = vpop.f32.mrf.mxu0 }
 0x125   :  { %v370_v49 = vadd.f32 %v1865_v35, %v369_v46 }
 0x126   :  { %v2094_v50 = vpop.f32.mrf.mxu1  ;;  %v2149_v47 = vpop.f32.mrf.mxu2 }
 0x127   :  { %v521_v52 = vmax.f32 %v370_v49, 0.0  ;;  %1474 = vmatmul.msk.f32.gmra.mxu0 %vm99_vm0, %v65_v48  ;;  %1558 = vmatmul.msk.f32.gmra.mxu2 %vm577_vm1, %v557_v44  ;;  %v480_v46 = vpop.f32.mrf.mxu3 }
 0x128   :  { %v481_v49 = vadd.f32 %v1865_v35, %v480_v46 }
 0x129   :  { %1522 = vmatmul.msk.f32.gmra.mxu1 %vm577_vm1, %v521_v52 }
 0x12a   :  { %v558_v53 = vmax.f32 %v481_v49, 0.0 }
 0x12c   :  { %v372_v54 = vpop.f32.mrf.mxu0 }
 0x12d   :  { %v373_v57 = vadd.f32 %v1865_v35, %v372_v54 }
 0x12e   :  { %v2104_v58 = vpop.f32.mrf.mxu1 }
 0x12f   :  { %v522_v60 = vmax.f32 %v373_v57, 0.0  ;;  %1475 = vmatmul.msk.f32.gmra.mxu0 %vm99_vm0, %v66_v56  ;;  %1559 = vmatmul.msk.f32.gmra.mxu2 %vm577_vm1, %v558_v53  ;;  %v483_v55 = vpop.f32.mrf.mxu3  ;;  %v2155_v56 = vpop.f32.mrf.mxu2 }
 0x130   :  { %v484_v59 = vadd.f32 %v1865_v35, %v483_v55 }
 0x131   :  { %1523 = vmatmul.msk.f32.gmra.mxu1 %vm577_vm1, %v522_v60 }
 0x134   :  { %v375_v62 = vpop.f32.mrf.mxu0 }
 0x135   :  { %v376_v0 = vadd.f32 %v1865_v35, %v375_v62  ;;  %v559_v62 = vmax.f32 %v484_v59, 0.0 }
 0x136   :  { %v2111_v1 = vpop.f32.mrf.mxu1 }
 0x137   :  { %v523_v3 = vmax.f32 %v376_v0, 0.0  ;;  %1560 = vmatmul.msk.f32.gmra.mxu2 %vm577_vm1, %v559_v62  ;;  %v486_v0 = vpop.f32.mrf.mxu3  ;;  %v2161_v2 = vpop.f32.mrf.mxu2 }
 0x138   :  { %v487_v4 = vadd.f32 %v1865_v35, %v486_v0 }
 0x139   :  { %1524 = vmatmul.msk.f32.gmra.mxu1 %vm577_vm1, %v523_v3 }
 0x13c   :  { %v378_v5 = vpop.f32.mrf.mxu0 }
 0x13d   :  { %v379_v7 = vadd.f32 %v1865_v35, %v378_v5 }
 0x13e   :  { %v2117_v8 = vpop.f32.mrf.mxu1 }
 0x13f   :  { %v524_v10 = vmax.f32 %v379_v7, 0.0  ;;  %v560_v7 = vmax.f32 %v487_v4, 0.0  ;;  %v2167_v11 = vpop.f32.mrf.mxu2 }
 0x141   :  { %1525 = vmatmul.msk.f32.gmra.mxu1 %vm577_vm1, %v524_v10  ;;  %1561 = vmatmul.msk.f32.gmra.mxu2 %vm577_vm1, %v560_v7  ;;  %v489_v10 = vpop.f32.mrf.mxu3 }
 0x142   :  { %v490_v13 = vadd.f32 %v1865_v35, %v489_v10 }
 0x144   :  { %v381_v12 = vpop.f32.mrf.mxu0  ;;  %v561_v19 = vmax.f32 %v490_v13, 0.0 }
 0x145   :  { %v382_v14 = vadd.f32 %v1865_v35, %v381_v12 }
 0x146   :  { %v2123_v16 = vpop.f32.mrf.mxu1 }
 0x147   :  { %v525_v18 = vmax.f32 %v382_v14, 0.0  ;;  %v2173_v14 = vld [vmem:[%s2446_s4] ss:$0 sm:$0xff]  ;;  %v2181_v27 = vpop.f32.mrf.mxu2 }
 0x148   :  { %v812_v7 = vadd.f32 %v2173_v14, %v2123_v16  ;;  %v806_v16 = vadd.f32 %v2173_v14, %v2111_v1  ;;  %v800_v1 = vadd.f32 %v2173_v14, %v2094_v50  ;;  %v794_v50 = vadd.f32 %v2173_v14, %v2074_v33 }
 0x149   :  { %1526 = vmatmul.msk.f32.gmra.mxu1 %vm577_vm1, %v525_v18  ;;  %1562 = vmatmul.msk.f32.gmra.mxu2 %vm577_vm1, %v561_v19  ;;  %v788_v33 = vadd.f32 %v2173_v14, %v2046_v15 }
 0x14a   :  { %v987_v13 = vmax.f32 %v812_v7, 0.0 }
 0x14c   :  { %v384_v20 = vpop.f32.mrf.mxu0 }
 0x14d   :  { %v385_v22 = vadd.f32 %v1865_v35, %v384_v20 }
 0x14e   :  { %v2129_v23 = vpop.f32.mrf.mxu1 }
 0x14f   :  { %v526_v26 = vmax.f32 %v385_v22, 0.0  ;;  %v2193_v46 = vpop.f32.mrf.mxu2  ;;  %v815_v0 = vadd.f32 %v2173_v14, %v2129_v23 }
 0x151   :  { %1527 = vmatmul.msk.f32.gmra.mxu1 %vm577_vm1, %v526_v26  ;;  %v492_v26 = vpop.f32.mrf.mxu3 }
 0x154   :  { %v387_v29 = vpop.f32.mrf.mxu0 }
 0x155   :  { %v388_v31 = vadd.f32 %v1865_v35, %v387_v29  ;;  %v493_v29 = vadd.f32 %v1865_v35, %v492_v26 }
 0x156   :  { %v2137_v32 = vpop.f32.mrf.mxu1 }
 0x157   :  { %v527_v36 = vmax.f32 %v388_v31, 0.0  ;;  %v818_v59 = vadd.f32 %v2173_v14, %v2137_v32 }
 0x159   :  { %1528 = vmatmul.msk.f32.gmra.mxu1 %vm577_vm1, %v527_v36 }
 0x15c   :  { %v390_v39 = vpop.f32.mrf.mxu0 }
 0x15d   :  { %v391_v41 = vadd.f32 %v1865_v35, %v390_v39  ;;  %v562_v39 = vmax.f32 %v493_v29, 0.0 }
 0x15e   :  { %v2145_v43 = vpop.f32.mrf.mxu1 }
 0x15f   :  { %v528_v45 = vmax.f32 %v391_v41, 0.0  ;;  %1563 = vmatmul.msk.f32.gmra.mxu2 %vm577_vm1, %v562_v39  ;;  %v983_v39 = vmax.f32 %v800_v1, 0.0 }
 0x161   :  { %1529 = vmatmul.msk.f32.gmra.mxu1 %vm577_vm1, %v528_v45  ;;  %v495_v45 = vpop.f32.mrf.mxu3 }
 0x164   :  { %v393_v48 = vpop.f32.mrf.mxu0 }
 0x165   :  { %v394_v51 = vadd.f32 %v1865_v35, %v393_v48  ;;  %v496_v48 = vadd.f32 %v1865_v35, %v495_v45 }
 0x166   :  { %v823_v52 = vpop.f32.mrf.mxu1 }
 0x167   :  { %v529_v54 = vmax.f32 %v394_v51, 0.0  ;;  %v824_v41 = vadd.f32 %v2173_v14, %v823_v52  ;;  %v821_v51 = vadd.f32 %v2173_v14, %v2145_v43  ;;  %v563_v52 = vmax.f32 %v496_v48, 0.0 }
 0x169   :  { %1530 = vmatmul.msk.f32.gmra.mxu1 %vm577_vm1, %v529_v54  ;;  %v991_v53 = vmax.f32 %v824_v41, 0.0  ;;  %1564 = vmatmul.msk.f32.gmra.mxu2 %vm577_vm1, %v563_v52  ;;  %v498_v43 = vpop.f32.mrf.mxu3  ;;  %v979_v52 = vmax.f32 %v788_v33, 0.0 }
 0x16a   :  { %v499_v62 = vadd.f32 %v1865_v35, %v498_v43  ;;  %v920_v43 = vadd.f32 %v2173_v14, %v2181_v27 }
 0x16c   :  { %v396_v57 = vpop.f32.mrf.mxu0  ;;  %v564_v32 = vmax.f32 %v499_v62, 0.0 }
 0x16d   :  { %v397_v60 = vadd.f32 %v1865_v35, %v396_v57 }
 0x16e   :  { %v826_v61 = vpop.f32.mrf.mxu1 }
 0x16f   :  { %v530_v63 = vmax.f32 %v397_v60, 0.0  ;;  %v827_v31 = vadd.f32 %v2173_v14, %v826_v61  ;;  %v990_v60 = vmax.f32 %v821_v51, 0.0  ;;  %v2207_v61 = vpop.f32.mrf.mxu2 }
 0x171   :  { %1531 = vmatmul.msk.f32.gmra.mxu1 %vm577_vm1, %v530_v63  ;;  %v992_v44 = vmax.f32 %v827_v31, 0.0  ;;  %1565 = vmatmul.msk.f32.gmra.mxu2 %vm577_vm1, %v564_v32 }
 0x174   :  { %v399_v3 = vpop.f32.mrf.mxu0 }
 0x175   :  { %v400_v5 = vadd.f32 %v1865_v35, %v399_v3  ;;  %v989_v3 = vmax.f32 %v818_v59, 0.0 }
 0x176   :  { %v829_v6 = vpop.f32.mrf.mxu1 }
 0x177   :  { %v531_v9 = vmax.f32 %v400_v5, 0.0  ;;  %v830_v22 = vadd.f32 %v2173_v14, %v829_v6  ;;  %v928_v23 = vpop.f32.mrf.mxu2 }
 0x178   :  { %v929_v51 = vadd.f32 %v2173_v14, %v928_v23 }
 0x179   :  { %1532 = vmatmul.msk.f32.gmra.mxu1 %vm577_vm1, %v531_v9  ;;  %v993_v34 = vmax.f32 %v830_v22, 0.0  ;;  %v988_v9 = vmax.f32 %v815_v0, 0.0 }
 0x17c   :  { %v402_v12 = vpop.f32.mrf.mxu0 }
 0x17d   :  { %v403_v17 = vadd.f32 %v1865_v35, %v402_v12  ;;  %v809_v12 = vadd.f32 %v2173_v14, %v2117_v8  ;;  %v803_v8 = vadd.f32 %v2173_v14, %v2104_v58  ;;  %v797_v58 = vadd.f32 %v2173_v14, %v2084_v42 }
 0x17e   :  { %v832_v18 = vpop.f32.mrf.mxu1  ;;  %v791_v42 = vadd.f32 %v2173_v14, %v2060_v24  ;;  %v926_v24 = vadd.f32 %v2173_v14, %v2207_v61  ;;  %v917_v61 = vadd.f32 %v2173_v14, %v2167_v11  ;;  %v908_v11 = vadd.f32 %v2173_v14, %v2149_v47 }
 0x17f   :  { %v532_v20 = vmax.f32 %v403_v17, 0.0  ;;  %v833_v21 = vadd.f32 %v2173_v14, %v832_v18  ;;  %v984_v31 = vmax.f32 %v803_v8, 0.0  ;;  %v982_v45 = vmax.f32 %v797_v58, 0.0 }
 0x180   :  { %v1025_v15 = vmax.f32 %v926_v24, 0.0 }
 0x181   :  { %v994_v25 = vmax.f32 %v833_v21, 0.0  ;;  %1533 = vmatmul.msk.f32.gmra.mxu1 %vm577_vm1, %v532_v20  ;;  %v986_v20 = vmax.f32 %v809_v12, 0.0  ;;  %v2231_v21 = vpop.f32.mrf.mxu2 }
 0x183   :  { %1566 = vmatpush.xpose.msk.msrb.mxu2 %vm1051_vm2, %v994_v25  ;;  %v985_v25 = vmax.f32 %v806_v16, 0.0 }
 0x184   :  { %v405_v30 = vpop.f32.mrf.mxu0 }
 0x185   :  { %v406_v36 = vadd.f32 %v1865_v35, %v405_v30 }
 0x186   :  { %v2186_v37 = vpop.f32.mrf.mxu1 }
 0x187   :  { %1567 = vmatpush.xpose.msk.msrb.mxu2 %vm1051_vm2, %v993_v34  ;;  %v533_v40 = vmax.f32 %v406_v36, 0.0 }
 0x189   :  { %1534 = vmatmul.msk.f32.gmra.mxu1 %vm577_vm1, %v533_v40  ;;  %v2243_v34 = vpop.f32.mrf.mxu2 }
 0x18b   :  { %1568 = vmatpush.xpose.msk.msrb.mxu2 %vm1051_vm2, %v992_v44 }
 0x18c   :  { %v408_v49 = vpop.f32.mrf.mxu0 }
 0x18d   :  { %v409_v54 = vadd.f32 %v1865_v35, %v408_v49  ;;  %v981_v49 = vmax.f32 %v794_v50, 0.0 }
 0x18e   :  { %v2199_v55 = vpop.f32.mrf.mxu1 }
 0x18f   :  { %1569 = vmatpush.xpose.msk.msrb.mxu2 %vm1051_vm2, %v991_v53  ;;  %v534_v57 = vmax.f32 %v409_v54, 0.0  ;;  %v980_v53 = vmax.f32 %v791_v42, 0.0  ;;  %v1026_v54 = vmax.f32 %v929_v51, 0.0 }
 0x191   :  { %1535 = vmatmul.msk.f32.gmra.mxu1 %vm577_vm1, %v534_v57  ;;  %v2255_v48 = vpop.f32.mrf.mxu2 }
 0x193   :  { %1570 = vmatpush.xpose.msk.msrb.mxu2 %vm1051_vm2, %v990_v60  ;;  %v923_v60 = vadd.f32 %v2173_v14, %v2193_v46  ;;  %v914_v46 = vadd.f32 %v2173_v14, %v2161_v2  ;;  %v905_v2 = vadd.f32 %v2173_v14, %v2141_v38 }
 0x194   :  { %v411_v63 = vpop.f32.mrf.mxu0 }
 0x195   :  { %v412_v4 = vadd.f32 %v1865_v35, %v411_v63  ;;  %v1024_v62 = vmax.f32 %v923_v60, 0.0  ;;  %v1021_v7 = vmax.f32 %v914_v46, 0.0 }
 0x196   :  { %v2213_v5 = vpop.f32.mrf.mxu1 }
 0x197   :  { %1571 = vmatpush.xpose.msk.msrb.mxu2 %vm1051_vm2, %v989_v3  ;;  %v535_v6 = vmax.f32 %v412_v4, 0.0  ;;  %v1023_v3 = vmax.f32 %v920_v43, 0.0  ;;  %v1022_v4 = vmax.f32 %v917_v61, 0.0 }
 0x199   :  { %1536 = vmatmul.msk.f32.gmra.mxu1 %vm577_vm1, %v535_v6  ;;  %v2266_v57 = vpop.f32.mrf.mxu2  ;;  %v911_v6 = vadd.f32 %v2173_v14, %v2155_v56  ;;  %v902_v56 = vadd.f32 %v2173_v14, %v2133_v28 }
 0x19b   :  { %1572 = vmatpush.xpose.msk.msrb.mxu2 %vm1051_vm2, %v988_v9  ;;  %v1020_v9 = vmax.f32 %v911_v6, 0.0  ;;  %v1017_v47 = vmax.f32 %v902_v56, 0.0 }
 0x19c   :  { %v414_v10 = vpop.f32.mrf.mxu0 }
 0x19d   :  { %v415_v17 = vadd.f32 %v1865_v35, %v414_v10  ;;  %v1019_v10 = vmax.f32 %v908_v11, 0.0 }
 0x19e   :  { %v2224_v18 = vpop.f32.mrf.mxu1 }
 0x19f   :  { %1573 = vmatpush.xpose.msk.msrb.mxu2 %vm1051_vm2, %v987_v13  ;;  %v536_v19 = vmax.f32 %v415_v17, 0.0  ;;  %v1018_v13 = vmax.f32 %v905_v2, 0.0  ;;  %v842_v2 = vadd.f32 %v2173_v14, %v2213_v5 }
 0x1a1   :  { %1537 = vmatmul.msk.f32.gmra.mxu1 %vm577_vm1, %v536_v19  ;;  %v2279_v0 = vpop.f32.mrf.mxu2 }
 0x1a3   :  { %1574 = vmatpush.xpose.msk.msrb.mxu2 %vm1051_vm2, %v986_v20 }
 0x1a4   :  { %v417_v22 = vpop.f32.mrf.mxu0 }
 0x1a5   :  { %v418_v26 = vadd.f32 %v1865_v35, %v417_v22 }
 0x1a6   :  { %v2236_v29 = vpop.f32.mrf.mxu1 }
 0x1a7   :  { %1575 = vmatpush.xpose.msk.msrb.mxu2 %vm1051_vm2, %v985_v25  ;;  %v537_v30 = vmax.f32 %v418_v26, 0.0 }
 0x1a9   :  { %1538 = vmatmul.msk.f32.gmra.mxu1 %vm577_vm1, %v537_v30  ;;  %v2288_v27 = vpop.f32.mrf.mxu2 }
 0x1ab   :  { %1576 = vmatpush.xpose.msk.msrb.mxu2 %vm1051_vm2, %v984_v31 }
 0x1ac   :  { %v420_v36 = vpop.f32.mrf.mxu0 }
 0x1ad   :  { %v421_v40 = vadd.f32 %v1865_v35, %v420_v36 }
 0x1ae   :  { %v2248_v41 = vpop.f32.mrf.mxu1 }
 0x1af   :  { %1577 = vmatpush.xpose.msk.msrb.mxu2 %vm1051_vm2, %v983_v39  ;;  %v538_v44 = vmax.f32 %v421_v40, 0.0 }
 0x1b1   :  { %1539 = vmatmul.msk.f32.gmra.mxu1 %vm577_vm1, %v538_v44  ;;  %v2298_v12 = vpop.f32.mrf.mxu2 }
 0x1b3   :  { %1578 = vmatpush.xpose.msk.msrb.mxu2 %vm1051_vm2, %v982_v45 }
 0x1b6   :  { %v2259_v35 = vpop.f32.mrf.mxu1 }
 0x1b7   :  { %1579 = vmatpush.xpose.msk.msrb.mxu2 %vm1051_vm2, %v981_v49  ;;  %v854_v61 = vadd.f32 %v2173_v14, %v2259_v35  ;;  %v845_v35 = vadd.f32 %v2173_v14, %v2224_v18  ;;  %v839_v18 = vadd.f32 %v2173_v14, %v2199_v55 }
 0x1b9   :  { %v2305_v19 = vpop.f32.mrf.mxu2 }
 0x1bb   :  { %1580 = vmatpush.xpose.msk.msrb.mxu2 %vm1051_vm2, %v980_v53 }
 0x1be   :  { %v2270_v59 = vpop.f32.mrf.mxu1 }
 0x1bf   :  { %1581 = vmatpush.xpose.msk.msrb.mxu2 %vm1051_vm2, %v979_v52 }
 0x1c1   :  { %v2307_v38 = vpop.f32.mrf.mxu2 }
 0x1c3   :  { %1600 = vmatpush.xpose.msk.msra.mxu2 %vm1051_vm2, %v1026_v54 }
 0x1c6   :  { %v859_v63 = vpop.f32.mrf.mxu1 }
 0x1c7   :  { %1601 = vmatpush.xpose.msk.msra.mxu2 %vm1051_vm2, %v1025_v15  ;;  %v860_v24 = vadd.f32 %v2173_v14, %v859_v63  ;;  %v857_v15 = vadd.f32 %v2173_v14, %v2270_v59  ;;  %v851_v63 = vadd.f32 %v2173_v14, %v2248_v41  ;;  %v848_v59 = vadd.f32 %v2173_v14, %v2236_v29 }
 0x1c9   :  { %v2309_v8 = vpop.f32.mrf.mxu2  ;;  %v1003_v43 = vmax.f32 %v860_v24, 0.0  ;;  %v1000_v6 = vmax.f32 %v851_v63, 0.0  ;;  %v999_v11 = vmax.f32 %v848_v59, 0.0 }
 0x1cb   :  { %1602 = vmatpush.xpose.msk.msra.mxu2 %vm1051_vm2, %v1024_v62 }
 0x1ce   :  { %v862_v32 = vpop.f32.mrf.mxu1 }
 0x1cf   :  { %1603 = vmatpush.xpose.msk.msra.mxu2 %vm1051_vm2, %v1023_v3  ;;  %v863_v33 = vadd.f32 %v2173_v14, %v862_v32  ;;  %v1002_v3 = vmax.f32 %v857_v15, 0.0  ;;  %v1044_v15 = vld [vmem:[#allocation2] sm:$0x1] }
 0x1d1   :  { %v2314_v1 = vpop.f32.mrf.mxu2  ;;  %v1004_v60 = vmax.f32 %v863_v33, 0.0 }
 0x1d2   :  { %v962_v33 = vadd.f32 %v2173_v14, %v2314_v1  ;;  %v953_v1 = vadd.f32 %v2173_v14, %v2305_v19  ;;  %v941_v19 = vadd.f32 %v2173_v14, %v2266_v57 }
 0x1d3   :  { %1604 = vmatpush.xpose.msk.msra.mxu2 %vm1051_vm2, %v1022_v4  ;;  %v1001_v4 = vmax.f32 %v854_v61, 0.0 }
 0x1d6   :  { %v865_v23 = vpop.f32.mrf.mxu1 }
 0x1d7   :  { %1605 = vmatpush.xpose.msk.msra.mxu2 %vm1051_vm2, %v1021_v7  ;;  %v866_v49 = vadd.f32 %v2173_v14, %v865_v23 }
 0x1d9   :  { %v2323_v45 = vpop.f32.mrf.mxu2  ;;  %v1005_v53 = vmax.f32 %v866_v49, 0.0  ;;  %v1043_v49 = vld [vmem:[%s2447_s5] sm:$0x1]  ;;  %s1692_s5 = smov [#allocation3]  }
 0x1da   :  { %1582 = vmatmul.msk.f32.vlgmr.msrb.gmra.mxu2 %vm1051_vm2, %v1043_v49  ;;  %s1427_s21 = sshll.u32 %s1692_s5, 4  ;;  %s1428_s21 = int_to_ptr.vmem [resolvable:$true] %s1427_s21 }
 0x1db   :  { %1606 = vmatpush.xpose.msk.msra.mxu2 %vm1051_vm2, %v1020_v9 }
 0x1de   :  { %v868_v17 = vpop.f32.mrf.mxu1 }
 0x1df   :  { %1607 = vmatpush.xpose.msk.msra.mxu2 %vm1051_vm2, %v1019_v10  ;;  %v869_v44 = vadd.f32 %v2173_v14, %v868_v17  ;;  %v998_v10 = vmax.f32 %v845_v35, 0.0  ;;  %v997_v17 = vmax.f32 %v842_v2, 0.0 }
 0x1e1   :  { %v1006_v51 = vmax.f32 %v869_v44, 0.0  ;;  %v967_v52 = vpop.f32.mrf.mxu2 }
 0x1e3   :  { %1608 = vmatpush.xpose.msk.msra.mxu2 %vm1051_vm2, %v1018_v13 }
 0x1e6   :  { %v871_v16 = vpop.f32.mrf.mxu1 }
 0x1e7   :  { %1609 = vmatpush.xpose.msk.msra.mxu2 %vm1051_vm2, %v1017_v47  ;;  %v872_v39 = vadd.f32 %v2173_v14, %v871_v16 }
 0x1e9   :  { %v1007_v50 = vmax.f32 %v872_v39, 0.0  ;;  %v970_v46 = vpop.f32.mrf.mxu2 }
 0x1ea   :  { %v971_v39 = vadd.f32 %v2173_v14, %v970_v46 }
 0x1ee   :  { %v874_v20 = vpop.f32.mrf.mxu1 }
 0x1ef   :  { %v875_v31 = vadd.f32 %v2173_v14, %v874_v20 }
 0x1f1   :  { %v1008_v40 = vmax.f32 %v875_v31, 0.0  ;;  %v973_v7 = vpop.f32.mrf.mxu2 }
 0x1f2   :  { %v974_v31 = vadd.f32 %v2173_v14, %v973_v7 }
 0x1f6   :  { %v877_v22 = vpop.f32.mrf.mxu1 }
 0x1f7   :  { %v878_v28 = vadd.f32 %v2173_v14, %v877_v22  ;;  %v836_v22 = vadd.f32 %v2173_v14, %v2186_v37 }
 0x1f9   :  { %v1009_v36 = vmax.f32 %v878_v28, 0.0  ;;  %v976_v47 = vpop.f32.mrf.mxu2 }
 0x1fa   :  { %v977_v5 = vadd.f32 %v2173_v14, %v976_v47 }
 0x1fc   :  { %v1042_v28 = vmax.f32 %v977_v5, 0.0 }
 0x1fe   :  { %v880_v25 = vpop.f32.mrf.mxu1 }
 0x1ff   :  { %v881_v26 = vadd.f32 %v2173_v14, %v880_v25  ;;  %v996_v25 = vmax.f32 %v839_v18, 0.0 }
 0x201   :  { %v1010_v30 = vmax.f32 %v881_v26, 0.0 }
 0x203   :  { %1583 = vmatpush.xpose.msk.msrb.mxu3 %vm1051_vm2, %v1010_v30  ;;  %v995_v30 = vmax.f32 %v836_v22, 0.0 }
 0x206   :  { %v2317_v58 = vpop.f32.mrf.mxu1 }
 0x207   :  { %1584 = vmatpush.xpose.msk.msrb.mxu3 %vm1051_vm2, %v1009_v36  ;;  %v884_v37 = vadd.f32 %v2173_v14, %v2317_v58  ;;  %v965_v58 = vadd.f32 %v2173_v14, %v2323_v45  ;;  %v956_v45 = vadd.f32 %v2173_v14, %v2307_v38  ;;  %v947_v38 = vadd.f32 %v2173_v14, %v2288_v27 }
 0x208   :  { %v935_v27 = vadd.f32 %v2173_v14, %v2243_v34 }
 0x209   :  { %v1011_v44 = vmax.f32 %v884_v37, 0.0  ;;  %v1032_v46 = vmax.f32 %v947_v38, 0.0 }
 0x20a   :  { %v1028_v59 = vmax.f32 %v935_v27, 0.0 }
 0x20b   :  { %1585 = vmatpush.xpose.msk.msrb.mxu3 %vm1051_vm2, %v1008_v40  ;;  %v1041_v40 = vmax.f32 %v974_v31, 0.0 }
 0x20e   :  { %v886_v42 = vpop.f32.mrf.mxu1 }
 0x20f   :  { %1586 = vmatpush.xpose.msk.msrb.mxu3 %vm1051_vm2, %v1007_v50  ;;  %v887_v26 = vadd.f32 %v2173_v14, %v886_v42  ;;  %v968_v50 = vadd.f32 %v2173_v14, %v967_v52  ;;  %v1040_v42 = vmax.f32 %v971_v39, 0.0  ;;  %v1037_v52 = vmax.f32 %v962_v33, 0.0 }
 0x211   :  { %v1012_v36 = vmax.f32 %v887_v26, 0.0 }
 0x213   :  { %1587 = vmatpush.xpose.msk.msrb.mxu3 %vm1051_vm2, %v1006_v51  ;;  %v1039_v51 = vmax.f32 %v968_v50, 0.0 }
 0x216   :  { %v889_v54 = vpop.f32.mrf.mxu1 }
 0x217   :  { %1588 = vmatpush.xpose.msk.msrb.mxu3 %vm1051_vm2, %v1005_v53  ;;  %v890_v16 = vadd.f32 %v2173_v14, %v889_v54  ;;  %v1038_v53 = vmax.f32 %v965_v58, 0.0  ;;  %v959_v54 = vadd.f32 %v2173_v14, %v2309_v8  ;;  %v950_v8 = vadd.f32 %v2173_v14, %v2298_v12 }
 0x218   :  { %v938_v12 = vadd.f32 %v2173_v14, %v2255_v48 }
 0x219   :  { %v1013_v55 = vmax.f32 %v890_v16, 0.0  ;;  %v1036_v24 = vmax.f32 %v959_v54, 0.0  ;;  %v1033_v61 = vmax.f32 %v950_v8, 0.0 }
 0x21b   :  { %1589 = vmatpush.xpose.msk.msrb.mxu3 %vm1051_vm2, %v1004_v60  ;;  %v1691_v60 = vmov 0  }
 0x21c   :  { %1646 = vset.pattern.permute.xlu0 %v1691_v60 }
 0x21d   :  { %1047 = vperm.xlu0 %1646, %v1044_v15  }
 0x21e   :  { %v892_v62 = vpop.f32.mrf.mxu1 }
 0x21f   :  { %1590 = vmatpush.xpose.msk.msrb.mxu3 %vm1051_vm2, %v1003_v43  ;;  %v893_v56 = vadd.f32 %v2173_v14, %v892_v62  ;;  %v1035_v43 = vmax.f32 %v956_v45, 0.0  ;;  %v1034_v62 = vmax.f32 %v953_v1, 0.0 }
 0x221   :  { %v1014_v20 = vmax.f32 %v893_v56, 0.0 }
 0x223   :  { %1591 = vmatpush.xpose.msk.msrb.mxu3 %vm1051_vm2, %v1002_v3  ;;  %v944_v3 = vadd.f32 %v2173_v14, %v2279_v0  ;;  %v932_v0 = vadd.f32 %v2173_v14, %v2231_v21 }
 0x225   :  { %v1031_v63 = vmax.f32 %v944_v3, 0.0  ;;  %v1027_v57 = vmax.f32 %v932_v0, 0.0 }
 0x226   :  { %v895_v32 = vpop.f32.mrf.mxu1 }
 0x227   :  { %1592 = vmatpush.xpose.msk.msrb.mxu3 %vm1051_vm2, %v1001_v4  ;;  %v896_v41 = vadd.f32 %v2173_v14, %v895_v32  ;;  %v1030_v4 = vmax.f32 %v941_v19, 0.0  ;;  %v1029_v32 = vmax.f32 %v938_v12, 0.0 }
 0x229   :  { %v1015_v13 = vmax.f32 %v896_v41, 0.0 }
 0x22b   :  { %1593 = vmatpush.xpose.msk.msrb.mxu3 %vm1051_vm2, %v1000_v6 }
 0x22e   :  { %v898_v9 = vpop.f32.mrf.mxu1 }
 0x22f   :  { %1594 = vmatpush.xpose.msk.msrb.mxu3 %vm1051_vm2, %v999_v11  ;;  %v899_v23 = vadd.f32 %v2173_v14, %v898_v9 }
 0x231   :  { %v1016_v29 = vmax.f32 %v899_v23, 0.0 }
 0x233   :  { %1595 = vmatpush.xpose.msk.msrb.mxu3 %vm1051_vm2, %v998_v10  ;;  %1610 = vmatpush.xpose.msk.msra.mxu2 %vm1051_vm2, %v1016_v29 }
 0x237   :  { %1596 = vmatpush.xpose.msk.msrb.mxu3 %vm1051_vm2, %v997_v17  ;;  %1611 = vmatpush.xpose.msk.msra.mxu2 %vm1051_vm2, %v1015_v13 }
 0x23b   :  { %1597 = vmatpush.xpose.msk.msrb.mxu3 %vm1051_vm2, %v996_v25  ;;  %1612 = vmatpush.xpose.msk.msra.mxu2 %vm1051_vm2, %v1014_v20 }
 0x23f   :  { %1598 = vmatpush.xpose.msk.msrb.mxu3 %vm1051_vm2, %v995_v30  ;;  %1613 = vmatpush.xpose.msk.msra.mxu2 %vm1051_vm2, %v1013_v55 }
 0x242   :  { %1599 = vmatmul.msk.f32.vlgmr.msrb.gmra.mxu3 %vm1051_vm2, %v1043_v49 }
 0x243   :  { %1617 = vmatpush.xpose.msk.msra.mxu3 %vm1051_vm2, %v1042_v28  ;;  %1614 = vmatpush.xpose.msk.msra.mxu2 %vm1051_vm2, %v1012_v36 }
 0x247   :  { %1618 = vmatpush.xpose.msk.msra.mxu3 %vm1051_vm2, %v1041_v40  ;;  %1615 = vmatpush.xpose.msk.msra.mxu2 %vm1051_vm2, %v1011_v44 }
 0x24a   :  { %1616 = vmatmul.msk.f32.vlgmr.msra.gmra.mxu2 %vm1051_vm2, %v1043_v49 }
 0x24b   :  { %1619 = vmatpush.xpose.msk.msra.mxu3 %vm1051_vm2, %v1040_v42 }
 0x24f   :  { %1620 = vmatpush.xpose.msk.msra.mxu3 %vm1051_vm2, %v1039_v51 }
 0x253   :  { %1621 = vmatpush.xpose.msk.msra.mxu3 %vm1051_vm2, %v1038_v53 }
 0x257   :  { %1622 = vmatpush.xpose.msk.msra.mxu3 %vm1051_vm2, %v1037_v52 }
 0x25b   :  { %1623 = vmatpush.xpose.msk.msra.mxu3 %vm1051_vm2, %v1036_v24 }
 0x25d   :  { %v1264_v48 = vpop.f32.mrf.mxu2 }
 0x25f   :  { %1624 = vmatpush.xpose.msk.msra.mxu3 %vm1051_vm2, %v1035_v43 }
 0x263   :  { %1625 = vmatpush.xpose.msk.msra.mxu3 %vm1051_vm2, %v1034_v62 }
 0x267   :  { %1626 = vmatpush.xpose.msk.msra.mxu3 %vm1051_vm2, %v1033_v61 }
 0x26b   :  { %1627 = vmatpush.xpose.msk.msra.mxu3 %vm1051_vm2, %v1032_v46 }
 0x26f   :  { %1628 = vmatpush.xpose.msk.msra.mxu3 %vm1051_vm2, %v1031_v63 }
 0x273   :  { %1629 = vmatpush.xpose.msk.msra.mxu3 %vm1051_vm2, %v1030_v4 }
 0x277   :  { %1630 = vmatpush.xpose.msk.msra.mxu3 %vm1051_vm2, %v1029_v32 }
 0x27b   :  { %1631 = vmatpush.xpose.msk.msra.mxu3 %vm1051_vm2, %v1028_v59 }
 0x27f   :  { %1632 = vmatpush.xpose.msk.msra.mxu3 %vm1051_vm2, %v1027_v57 }
 0x282   :  { %1633 = vmatmul.msk.f32.vlgmr.msra.gmra.mxu3 %vm1051_vm2, %v1043_v49 }
 0x28f   :  { %v1048_v6 = vpop.permute.xlu0 %1047 }
 0x290   :  { %v1050_v7 = vperm.slane %v1048_v6, 0 }
 0x292   :  { %v1265_v41 = vadd.f32 %v1264_v48, %v1050_v7 }
 0x294   :  { %v1327_v10 = vsub.f32 0.0, %v1265_v41 }
 0x296   :  { %v1331_v29 = vmul.f32 1.442695, %v1327_v10 }
 0x2c5   :  { %v1284_v35 = vpop.f32.mrf.mxu3 }
 0x2c6   :  { %v1285_v34 = vadd.f32 %v1284_v35, %v1050_v7 }
 0x2c8   :  { %v1328_v23 = vsub.f32 0.0, %v1285_v34 }
 0x2ca   :  { %v1333_v14 = vmul.f32 1.442695, %v1328_v23 }
 0x2cc   :  { %1649 = vpow2.f32 %v1333_v14 }
 0x2cd   :  { %v1304_v11 = vpop.f32.mrf.mxu2 }
 0x2ce   :  { %v1305_v9 = vadd.f32 %v1304_v11, %v1050_v7 }
 0x2d0   :  { %v1329_v2 = vsub.f32 0.0, %v1305_v9 }
 0x2d2   :  { %v1335_v21 = vmul.f32 1.442695, %v1329_v2  ;;  %v1650_v56 = vpop.eup %1649 }
 0x2d3   :  { %v1340_v17 = vadd.f32 1.0, %v1650_v56 }
 0x2d4   :  { %1651 = vpow2.f32 %v1335_v21 }
 0x2d5   :  { %1653 = vpow2.f32 %v1331_v29  ;;  %vm1363_vm3 = vweird.f32 %v1340_v17  ;;  %v1369_v51 = vand.u32 2147483648, %v1340_v17  ;;  %v1367_v53 = vand.u32 2147483647, %v1340_v17 }
 0x2d6   :  { %1655 = vrcp.f32 %v1340_v17 }
 0x2d7   :  { %v1370_v62 = vor.u32 1.1754944e-38, %v1369_v51  ;;  %vm1368_vm11 = vcmp.eq.f32.partialorder %v1367_v53, 8.507059e+37 }
 0x2da   :  { %v1652_v13 = vpop.eup %1651 }
 0x2db   :  { %v1654_v18 = vpop.eup %1653  ;;  %v1341_v47 = vadd.f32 1.0, %v1652_v13 }
 0x2dc   :  { %v1339_v16 = vadd.f32 1.0, %v1654_v18  ;;  %v1656_v26 = vpop.eup %1655 }
 0x2dd   :  { %1657 = vrcp.f32 %v1341_v47  ;;  %v1359_v30 = vmul.f32 %v1656_v26, %v1340_v17  ;;  %vm1364_vm4 = vweird.f32 %v1656_v26  ;;  %vm1378_vm5 = vweird.f32 %v1341_v47 }
 0x2de   :  { %1659 = vrcp.f32 %v1339_v16  ;;  %v1384_v52 = vand.u32 2147483648, %v1341_v47  ;;  %vm2421_vm7 = vmor %vm1363_vm3, %vm1364_vm4  ;;  %vm1348_vm8 = vweird.f32 %v1339_v16  ;;  %v1382_v1 = vand.u32 2147483647, %v1341_v47 }
 0x2df   :  { %v1360_v39 = vsub.f32 1.0, %v1359_v30  ;;  %v1354_v8 = vand.u32 2147483648, %v1339_v16  ;;  %v1352_v61 = vand.u32 2147483647, %v1339_v16  ;;  %vm1410_vm3 = vcmask 1040384  }
 0x2e0   :  { %v1385_v12 = vor.u32 1.1754944e-38, %v1384_v52  ;;  %vm1383_vm13 = vcmp.eq.f32.partialorder %v1382_v1, 8.507059e+37  ;;  %vm1412_vm4 = vcmask 1042434  }
 0x2e1   :  { %v1361_v42 = vmul.f32 %v1656_v26, %v1360_v39  ;;  %v1355_v32 = vor.u32 1.1754944e-38, %v1354_v8  ;;  %vm1353_vm0 = vcmp.eq.f32.partialorder %v1352_v61, 8.507059e+37 }
 0x2e3   :  { %v1658_v55 = vpop.eup %1657  ;;  %v1362_v33 = vadd.f32 %v1656_v26, %v1361_v42 }
 0x2e4   :  { %v1660_v28 = vpop.eup %1659  ;;  %v1374_v31 = vmul.f32 %v1658_v55, %v1341_v47  ;;  %vm1379_vm6 = vweird.f32 %v1658_v55 }
 0x2e5   :  { %v1344_v36 = vmul.f32 %v1660_v28, %v1339_v16  ;;  %vm1349_vm9 = vweird.f32 %v1660_v28  ;;  %vm2425_vm10 = vmor %vm1378_vm5, %vm1379_vm6  ;;  %v1366_v3 = vsel %vm2421_vm7, %v1656_v26, %v1362_v33  ;;  %vm1414_vm5 = vcmask 1041408  }
 0x2e6   :  { %v1375_v40 = vsub.f32 1.0, %v1374_v31  ;;  %vm2431_vm12 = vmor %vm1348_vm8, %vm1349_vm9  ;;  %v1371_v0 = vsel %vm1368_vm11, %v1370_v62, %v1366_v3 }
 0x2e7   :  { %v1345_v50 = vsub.f32 1.0, %v1344_v36  ;;  %v1407_v11 = vrot.slane %v1371_v0, 7 }
 0x2e8   :  { %v1376_v49 = vmul.f32 %v1658_v55, %v1375_v40 }
 0x2e9   :  { %v1346_v58 = vmul.f32 %v1660_v28, %v1345_v50 }
 0x2ea   :  { %v1377_v24 = vadd.f32 %v1658_v55, %v1376_v49 }
 0x2eb   :  { %v1347_v43 = vadd.f32 %v1660_v28, %v1346_v58 }
 0x2ec   :  { %v1381_v63 = vsel %vm2425_vm10, %v1658_v55, %v1377_v24 }
 0x2ed   :  { %v1351_v59 = vsel %vm2431_vm12, %v1660_v28, %v1347_v43  ;;  %v1386_v48 = vsel %vm1383_vm13, %v1385_v12, %v1381_v63 }
 0x2ee   :  { %v1356_v34 = vsel %vm1353_vm0, %v1355_v32, %v1351_v59  ;;  %v1408_v41 = vrot.slane %v1386_v48, 6 }
 0x2ef   :  { %v1411_v2 = vsel %vm1410_vm3, %v1356_v34, %v1407_v11 }
 0x305   :  { %v1324_v20 = vpop.f32.mrf.mxu3 }
 0x306   :  { %v1325_v5 = vadd.f32 %v1324_v20, %v1050_v7  ;;  %v1417_v7 = vlaneseq }
 0x308   :  { %v1330_v22 = vsub.f32 0.0, %v1325_v5  ;;  %vm1419_vm6 = vcmp.lt.s32.totalorder %v1417_v7, 512 }
 0x30a   :  { %v1337_v25 = vmul.f32 1.442695, %v1330_v22 }
 0x30c   :  { %1661 = vpow2.f32 %v1337_v25 }
 0x312   :  { %v1662_v37 = vpop.eup %1661 }
 0x313   :  { %v1342_v44 = vadd.f32 1.0, %v1662_v37 }
 0x315   :  { %1663 = vrcp.f32 %v1342_v44  ;;  %v1399_v46 = vand.u32 2147483648, %v1342_v44  ;;  %v1397_v27 = vand.u32 2147483647, %v1342_v44  ;;  %vm1393_vm15 = vweird.f32 %v1342_v44 }
 0x317   :  { %v1400_v6 = vor.u32 1.1754944e-38, %v1399_v46  ;;  %vm1398_vm2 = vcmp.eq.f32.partialorder %v1397_v27, 8.507059e+37 }
 0x31b   :  { %v1664_v54 = vpop.eup %1663 }
 0x31c   :  { %v1389_v60 = vmul.f32 %v1664_v54, %v1342_v44  ;;  %vm1394_vm14 = vweird.f32 %v1664_v54 }
 0x31d   :  { %vm1395_vm1 = vmor %vm1393_vm15, %vm1394_vm14 }
 0x31e   :  { %v1390_v38 = vsub.f32 1.0, %v1389_v60 }
 0x320   :  { %v1391_v4 = vmul.f32 %v1664_v54, %v1390_v38 }
 0x322   :  { %v1392_v57 = vadd.f32 %v1664_v54, %v1391_v4 }
 0x324   :  { %v1396_v35 = vsel %vm1395_vm1, %v1664_v54, %v1392_v57 }
 0x325   :  { %v1401_v9 = vsel %vm1398_vm2, %v1400_v6, %v1396_v35 }
 0x326   :  { %v1409_v23 = vrot.slane %v1401_v9, 5 }
 0x328   :  { %v1413_v10 = vsel %vm1412_vm4, %v1408_v41, %v1409_v23 }
 0x329   :  { %v1415_v14 = vsel %vm1414_vm5, %v1411_v2, %v1413_v10 }
 0x32a   :  { %1421 = vst.msk [vmem:[#allocation3] sm:$0xf] %vm1419_vm6, %v1415_v14 }
 0x32b   :  { %1432 = dma.vmem_to_hbm [thread:$0]  %s1428_s21, 64, %s1430_s2, [#allocation4]  }
 0x32c   :  { %1689 = dma.done.wait [#allocation4], 64  }
 0x32d   :  { %1690 = vsyncadd [#allocation4], 4294967232 }
 0x32e   :  { %1437 = vsyncpa [#allocation4], 1 }

</bundles_post_ra>
